<compile_context>
chip_gen: v7x
topology: tpu7x:2x2x1
jax: 0.10.0
libtpu: 0.0.40
codegen_flags: <defaults>
</compile_context>

<pallas_src>
import functools

import jax
import jax.numpy as jnp
from jax.experimental import pallas as pl
from jax.experimental.pallas import tpu as pltpu


def _round_up(x, m):
    return ((x + m - 1) // m) * m


def _round_down(x, m):
    return (x // m) * m


# ---------------------------------------------------------------------------
# Kernel
# ---------------------------------------------------------------------------
def _dice_kernel(pred_ref, target_ref, inter_ref, denom_ref,
                 inter_acc, denom_acc, *,
                 n_valid, tile_n, k_per_part, mask_cols):
    """Per-row sum(p*t) and sum(p+t) over the spatial axis.

    Grid = (partition, row_block, spatial_block); spatial is innermost
    ("arbitrary"), partition and rows are "parallel".  Per-partition partial
    (inter, denom) sums are written on the last spatial step.
    """
    k = pl.program_id(2)

    @pl.when(k == 0)
    def _():
        inter_acc[...] = jnp.zeros_like(inter_acc)
        denom_acc[...] = jnp.zeros_like(denom_acc)

    # Upcast per tile: inputs may be bf16/f16; accumulation stays f32.
    p = pred_ref[...].astype(jnp.float32)
    t = target_ref[...].astype(jnp.float32)

    if mask_cols:
        part = pl.program_id(0)
        col0 = (part * k_per_part + k) * tile_n       # un-clamped global offset
        overhangs = col0 + tile_n > n_valid           # scalar: tile crosses N?

        @pl.when(jnp.logical_not(overhangs))
        def _():
            inter_acc[...] += jnp.sum(p * t, axis=1, keepdims=True)
            denom_acc[...] += jnp.sum(p + t, axis=1, keepdims=True)

        @pl.when(overhangs)
        def _():
            col = jax.lax.broadcasted_iota(jnp.int32, p.shape, 1) + col0
            valid = col < n_valid
            pm = jnp.where(valid, p, 0.0)
            tm = jnp.where(valid, t, 0.0)
            inter_acc[...] += jnp.sum(pm * tm, axis=1, keepdims=True)
            denom_acc[...] += jnp.sum(pm + tm, axis=1, keepdims=True)
    else:
        inter_acc[...] += jnp.sum(p * t, axis=1, keepdims=True)
        denom_acc[...] += jnp.sum(p + t, axis=1, keepdims=True)

    @pl.when(k == pl.num_programs(2) - 1)
    def _():
        inter_ref[0, :, :] = inter_acc[...]
        denom_ref[0, :, :] = denom_acc[...]


# ---------------------------------------------------------------------------
# Tile selection
# ---------------------------------------------------------------------------
def _choose_tiles(BC, N, in_bytes_per_elem):
    """Pick (TM, TN).

    Working-set model (kept <= 36 MiB -> safe on v7x's 64 MiB physical VMEM):
      double-buffered inputs : 2 * TM * TN * in_bytes_per_elem
      f32 upcast temporaries : ~2 * TM * TN * 4
    Per-step HBM traffic target >= ~8 MiB so the ~0.35 us/step grid overhead
    is amortized.  Rows shrink before lanes; TN never collapses toward 128.
    """
    WORKING_SET = 36 * 1024 * 1024
    TARGET_STEP = 8 * 1024 * 1024
    MIN_TN = 1024
    per_elem_ws = 2 * in_bytes_per_elem + 8
    max_elems = max(WORKING_SET // per_elem_ws, 8 * 128)

    # Rows: largest multiple of 8 <= BC, capped near BC/2 so the parallel row
    # axis has >= 2 blocks (v7x megacore).  BC < 16 keeps the full row extent.
    if BC >= 16:
        tm = min(_round_down(BC, 8), _round_up((BC + 1) // 2, 8))
    else:
        tm = BC

    n_pad = _round_up(N, 128)
    if tm * n_pad <= max_elems:
        return tm, N                       # whole spatial extent in one block

    # Spatial axis must be tiled: shrink rows (multiples of 8) until a
    # lane-dense TN fits the budget; never shrink TN below MIN_TN here.
    while tm > 8 and (max_elems // tm) < MIN_TN:
        tm = max(_round_down(tm // 2, 8), 8)

    target_tn = _round_up(-(-TARGET_STEP // (tm * in_bytes_per_elem)), 128)
    budget_tn = _round_down(max_elems // tm, 128)
    tn = min(max(target_tn, MIN_TN), budget_tn, n_pad)
    tn = max(_round_down(tn, 128), 128)
    return tm, tn


# ---------------------------------------------------------------------------
# Wrapper
# ---------------------------------------------------------------------------
def dice_loss(pred, target, smooth=1e-6, *, tiles=None, partitions=None):
    """Returns (dice_loss scalar, dice of shape (B, C)) matching the torch module.

    `tiles` / `partitions` override the auto tile/partition choice (tests only).
    """
    assert pred.shape == target.shape, "Pred and target must have the same shape"
    B, C = pred.shape[0], pred.shape[1]
    # Free reshape of the contiguous NCHW / NCDHW input; no pad, no dtype copy.
    pred_f = pred.reshape(B * C, -1)
    target_f = target.reshape(B * C, -1)
    BC, N = pred_f.shape

    in_bytes_per_elem = pred_f.dtype.itemsize + target_f.dtype.itemsize
    if tiles is None:
        TM, TN = _choose_tiles(BC, N, in_bytes_per_elem)
    else:
        TM, TN = tiles

    row_blocks = pl.cdiv(BC, TM)
    total_k = pl.cdiv(N, TN)
    if partitions is None:
        # v7x megacore: if the rows give only one parallel block, split the
        # spatial reduction into two parallel partitions instead.
        P = 2 if (row_blocks == 1 and total_k >= 2) else 1
    else:
        P = partitions
    k_per_part = pl.cdiv(total_k, P)
    mask_cols = (N % TN != 0) or (P * k_per_part != total_k)

    def in_map(p, i, k):
        # Un-clamped global spatial block is p * k_per_part + k; clamp the DMA
        # source in-bounds (the kernel zero-masks the over-hanging columns).
        return (i, jnp.minimum(p * k_per_part + k, total_k - 1))

    kernel = functools.partial(_dice_kernel, n_valid=N, tile_n=TN,
                               k_per_part=k_per_part, mask_cols=mask_cols)

    cost = pl.CostEstimate(
        flops=4 * BC * N,
        transcendentals=0,
        bytes_accessed=BC * N * in_bytes_per_elem + 2 * P * BC * 4,
    )

    inter_p, denom_p = pl.pallas_call(
        kernel,
        out_shape=(
            jax.ShapeDtypeStruct((P, BC, 1), jnp.float32),   # per-partition inter
            jax.ShapeDtypeStruct((P, BC, 1), jnp.float32),   # per-partition denom
        ),
        grid_spec=pltpu.PrefetchScalarGridSpec(
            num_scalar_prefetch=0,
            grid=(P, row_blocks, k_per_part),
            in_specs=[
                pl.BlockSpec((TM, TN), in_map),
                pl.BlockSpec((TM, TN), in_map),
            ],
            out_specs=[
                pl.BlockSpec((1, TM, 1), lambda p, i, k: (p, i, 0)),
                pl.BlockSpec((1, TM, 1), lambda p, i, k: (p, i, 0)),
            ],
            scratch_shapes=[
                pltpu.VMEM((TM, 1), jnp.float32),   # intersection accumulator
                pltpu.VMEM((TM, 1), jnp.float32),   # denominator accumulator
            ],
        ),
        compiler_params=pltpu.CompilerParams(
            dimension_semantics=("parallel", "parallel", "arbitrary"),
            vmem_limit_bytes=48 * 1024 * 1024,
        ),
        cost_estimate=cost,
    )(pred_f, target_f)

    # Tiny wrapper glue over (P, BC) partials (in-kernel mean dropped per review).
    inter = jnp.sum(inter_p[:, :, 0], axis=0)
    denom = jnp.sum(denom_p[:, :, 0], axis=0)
    dice = ((2.0 * inter + smooth) / (denom + smooth)).reshape(B, C)
    return 1.0 - jnp.mean(dice), dice


def _reference(pred, target, smooth=1e-6):
    B, C = pred.shape[0], pred.shape[1]
    p = pred.reshape(B, C, -1).astype(jnp.float32)
    t = target.reshape(B, C, -1).astype(jnp.float32)
    inter = (p * t).sum(axis=2)
    denom = p.sum(axis=2) + t.sum(axis=2)
    dice = (2.0 * inter + smooth) / (denom + smooth)
    return 1.0 - dice.mean(), dice


if __name__ == "__main__":
    key = jax.random.PRNGKey(0)
    k1, k2 = jax.random.split(key)

    def make_inputs(shape, dtype=jnp.float32):
        B, C = shape[0], shape[1]
        logits = jax.random.normal(k1, shape, jnp.float32)
        pred = jax.nn.softmax(logits, axis=1).astype(dtype)
        labels = jax.random.randint(k2, (B,) + shape[2:], 0, C)
        target = jnp.moveaxis(jax.nn.one_hot(labels, C, dtype=dtype), -1, 1)
        return pred, target

    # Case 1: canonical small shape, f32 — single-spatial-block path.
    pred, target = make_inputs((2, 4, 16, 16))
    loss, dice = dice_loss(pred, target)
    jax.block_until_ready((loss, dice))
    ref_loss, ref_dice = _reference(pred, target)
    assert jnp.allclose(loss, ref_loss, atol=1e-5, rtol=1e-5), (loss, ref_loss)
    assert jnp.allclose(dice, ref_dice, atol=1e-5, rtol=1e-5)

    # Case 2: bf16 inputs exercise the in-kernel upcast (half the HBM bytes).
    loss_bf, dice_bf = dice_loss(pred.astype(jnp.bfloat16),
                                 target.astype(jnp.bfloat16))
    jax.block_until_ready((loss_bf, dice_bf))
    ref_loss_bf, ref_dice_bf = _reference(pred.astype(jnp.bfloat16),
                                          target.astype(jnp.bfloat16))
    assert jnp.allclose(loss_bf, ref_loss_bf, atol=2e-3, rtol=2e-3)
    assert jnp.allclose(dice_bf, ref_dice_bf, atol=2e-3, rtol=2e-3)

    # Case 3: forced small tiles + 2-way spatial partition + ragged tail
    # (covers the tiled / clamped / masked path without needing a huge input).
    pred3, target3 = make_inputs((2, 4, 46, 46))      # N = 2116, not % 128
    loss3, dice3 = dice_loss(pred3, target3, tiles=(8, 128), partitions=2)
    jax.block_until_ready((loss3, dice3))
    ref_loss3, ref_dice3 = _reference(pred3, target3)
    assert jnp.allclose(loss3, ref_loss3, atol=1e-5, rtol=1e-5)
    assert jnp.allclose(dice3, ref_dice3, atol=1e-5, rtol=1e-5)

    # Case 4: BC >= 16 -> capped row tile (two parallel row blocks, ragged last).
    pred4, target4 = make_inputs((4, 6, 8, 8))        # BC = 24 -> TM = 16
    loss4, dice4 = dice_loss(pred4, target4)
    jax.block_until_ready((loss4, dice4))
    ref_loss4, ref_dice4 = _reference(pred4, target4)
    assert jnp.allclose(loss4, ref_loss4, atol=1e-5, rtol=1e-5)
    assert jnp.allclose(dice4, ref_dice4, atol=1e-5, rtol=1e-5)

    print("KERNEL_OK")
</pallas_src>

<mosaic_0001>
module attributes {stable_mosaic.version = 11 : i64} {
  func.func @_dice_kernel(%arg0: i32, %arg1: i32, %arg2: i32, %arg3: memref<8x256xf32, #tpu.memory_space<vmem>>, %arg4: memref<8x256xf32, #tpu.memory_space<vmem>>, %arg5: memref<1x8x1xf32, #tpu.memory_space<vmem>>, %arg6: memref<1x8x1xf32, #tpu.memory_space<vmem>>, %arg7: memref<8x1xf32, #tpu.memory_space<vmem>>, %arg8: memref<8x1xf32, #tpu.memory_space<vmem>>) attributes {dimension_semantics = [#tpu.dimension_semantics<parallel>, #tpu.dimension_semantics<parallel>, #tpu.dimension_semantics<arbitrary>], iteration_bounds = array<i64: 1, 1, 1>, scalar_prefetch = 0 : i64, scratch_operands = 2 : i64, tpu.core_type = #tpu.core_type<tc>, window_params = [{transform_indices = @transform_0, window_bounds = array<i64: 8, 256>}, {transform_indices = @transform_1, window_bounds = array<i64: 8, 256>}, {transform_indices = @transform_2, window_bounds = array<i64: 1, 8, 1>}, {transform_indices = @transform_3, window_bounds = array<i64: 1, 8, 1>}]} {
    %c0_i32 = arith.constant 0 : i32
    %0 = arith.cmpi eq, %arg2, %c0_i32 : i32
    %1 = arith.extui %0 : i1 to i32
    %c0_i32_0 = arith.constant 0 : i32
    %2 = arith.cmpi ne, %1, %c0_i32_0 : i32
    scf.if %2 {
      %cst_15 = arith.constant 0.000000e+00 : f32
      %20 = vector.broadcast %cst_15 : f32 to vector<8x1xf32>
      %c0_16 = arith.constant 0 : index
      %c0_17 = arith.constant 0 : index
      %21 = vector.load %arg7[%c0_16, %c0_17] : memref<8x1xf32, #tpu.memory_space<vmem>>, vector<8x1xf32>
      tpu.vector_store %arg7[%c0_16, %c0_17], %20 {strides = array<i32>} : memref<8x1xf32, #tpu.memory_space<vmem>>, vector<8x1xf32>,
      %cst_18 = arith.constant 0.000000e+00 : f32
      %22 = vector.broadcast %cst_18 : f32 to vector<8x1xf32>
      %c0_19 = arith.constant 0 : index
      %c0_20 = arith.constant 0 : index
      %23 = vector.load %arg8[%c0_19, %c0_20] : memref<8x1xf32, #tpu.memory_space<vmem>>, vector<8x1xf32>
      tpu.vector_store %arg8[%c0_19, %c0_20], %22 {strides = array<i32>} : memref<8x1xf32, #tpu.memory_space<vmem>>, vector<8x1xf32>,
    } else {
    }
    %c0 = arith.constant 0 : index
    %c0_1 = arith.constant 0 : index
    %3 = vector.load %arg3[%c0, %c0_1] : memref<8x256xf32, #tpu.memory_space<vmem>>, vector<8x256xf32>
    %c0_2 = arith.constant 0 : index
    %c0_3 = arith.constant 0 : index
    %4 = vector.load %arg4[%c0_2, %c0_3] : memref<8x256xf32, #tpu.memory_space<vmem>>, vector<8x256xf32>
    %c0_4 = arith.constant 0 : index
    %c0_5 = arith.constant 0 : index
    %5 = vector.load %arg7[%c0_4, %c0_5] : memref<8x1xf32, #tpu.memory_space<vmem>>, vector<8x1xf32>
    %6 = arith.mulf %3, %4 : vector<8x256xf32>
    %cst = arith.constant dense<0.000000e+00> : vector<8xf32>
    %7 = vector.multi_reduction <add>, %6, %cst [1] : vector<8x256xf32> to vector<8xf32>
    %8 = vector.shape_cast %7 : vector<8xf32> to vector<8x1xf32>
    %9 = arith.addf %5, %8 : vector<8x1xf32>
    %c0_6 = arith.constant 0 : index
    %c0_7 = arith.constant 0 : index
    %10 = vector.load %arg7[%c0_6, %c0_7] : memref<8x1xf32, #tpu.memory_space<vmem>>, vector<8x1xf32>
    tpu.vector_store %arg7[%c0_6, %c0_7], %9 {strides = array<i32>} : memref<8x1xf32, #tpu.memory_space<vmem>>, vector<8x1xf32>,
    %c0_8 = arith.constant 0 : index
    %c0_9 = arith.constant 0 : index
    %11 = vector.load %arg8[%c0_8, %c0_9] : memref<8x1xf32, #tpu.memory_space<vmem>>, vector<8x1xf32>
    %12 = arith.addf %3, %4 : vector<8x256xf32>
    %cst_10 = arith.constant dense<0.000000e+00> : vector<8xf32>
    %13 = vector.multi_reduction <add>, %12, %cst_10 [1] : vector<8x256xf32> to vector<8xf32>
    %14 = vector.shape_cast %13 : vector<8xf32> to vector<8x1xf32>
    %15 = arith.addf %11, %14 : vector<8x1xf32>
    %c0_11 = arith.constant 0 : index
    %c0_12 = arith.constant 0 : index
    %16 = vector.load %arg8[%c0_11, %c0_12] : memref<8x1xf32, #tpu.memory_space<vmem>>, vector<8x1xf32>
    tpu.vector_store %arg8[%c0_11, %c0_12], %15 {strides = array<i32>} : memref<8x1xf32, #tpu.memory_space<vmem>>, vector<8x1xf32>,
    %c0_i32_13 = arith.constant 0 : i32
    %17 = arith.cmpi eq, %arg2, %c0_i32_13 : i32
    %18 = arith.extui %17 : i1 to i32
    %c0_i32_14 = arith.constant 0 : i32
    %19 = arith.cmpi ne, %18, %c0_i32_14 : i32
    scf.if %19 {
      %c0_15 = arith.constant 0 : index
      %c0_16 = arith.constant 0 : index
      %20 = vector.load %arg7[%c0_15, %c0_16] : memref<8x1xf32, #tpu.memory_space<vmem>>, vector<8x1xf32>
      %c0_17 = arith.constant 0 : index
      %c0_18 = arith.constant 0 : index
      %c0_19 = arith.constant 0 : index
      %21 = vector.load %arg5[%c0_17, %c0_18, %c0_19] : memref<1x8x1xf32, #tpu.memory_space<vmem>>, vector<1x8x1xf32>
      %22 = vector.shape_cast %21 : vector<1x8x1xf32> to vector<8x1xf32>
      %23 = vector.shape_cast %20 : vector<8x1xf32> to vector<1x8x1xf32>
      tpu.vector_store %arg5[%c0_17, %c0_18, %c0_19], %23 {strides = array<i32>} : memref<1x8x1xf32, #tpu.memory_space<vmem>>, vector<1x8x1xf32>,
      %c0_20 = arith.constant 0 : index
      %c0_21 = arith.constant 0 : index
      %24 = vector.load %arg8[%c0_20, %c0_21] : memref<8x1xf32, #tpu.memory_space<vmem>>, vector<8x1xf32>
      %c0_22 = arith.constant 0 : index
      %c0_23 = arith.constant 0 : index
      %c0_24 = arith.constant 0 : index
      %25 = vector.load %arg6[%c0_22, %c0_23, %c0_24] : memref<1x8x1xf32, #tpu.memory_space<vmem>>, vector<1x8x1xf32>
      %26 = vector.shape_cast %25 : vector<1x8x1xf32> to vector<8x1xf32>
      %27 = vector.shape_cast %24 : vector<8x1xf32> to vector<1x8x1xf32>
      tpu.vector_store %arg6[%c0_22, %c0_23, %c0_24], %27 {strides = array<i32>} : memref<1x8x1xf32, #tpu.memory_space<vmem>>, vector<1x8x1xf32>,
    } else {
    }
    return
  }
  func.func @transform_0(%arg0: i32, %arg1: i32, %arg2: i32) -> (i32, i32) {
    %c1_i32 = arith.constant 1 : i32
    %0 = arith.muli %arg0, %c1_i32 : i32
    %1 = arith.addi %0, %arg2 : i32
    %c0_i32 = arith.constant 0 : i32
    %2 = arith.minsi %1, %c0_i32 : i32
    %c0_i32_0 = arith.constant 0 : i32
    return %arg1, %2 : i32, i32
  }
  func.func @transform_1(%arg0: i32, %arg1: i32, %arg2: i32) -> (i32, i32) {
    %c1_i32 = arith.constant 1 : i32
    %0 = arith.muli %arg0, %c1_i32 : i32
    %1 = arith.addi %0, %arg2 : i32
    %c0_i32 = arith.constant 0 : i32
    %2 = arith.minsi %1, %c0_i32 : i32
    %c0_i32_0 = arith.constant 0 : i32
    return %arg1, %2 : i32, i32
  }
  func.func @transform_2(%arg0: i32, %arg1: i32, %arg2: i32) -> (i32, i32, i32) {
    %c0_i32 = arith.constant 0 : i32
    %c0_i32_0 = arith.constant 0 : i32
    return %arg0, %arg1, %c0_i32 : i32, i32, i32
  }
  func.func @transform_3(%arg0: i32, %arg1: i32, %arg2: i32) -> (i32, i32, i32) {
    %c0_i32 = arith.constant 0 : i32
    %c0_i32_0 = arith.constant 0 : i32
    return %arg0, %arg1, %c0_i32 : i32, i32, i32
  }
}

</mosaic_0001>

<bundles_post_ra>
// kernel: tpu_custom_call.1
= control target key start
LH: loop header
LB: loop body
LE: loop exit
PB: predicated region body
PF: predicated region fallthrough
CT: control target
= control target key end

     0   :  { %9 = vsyncpa [#allocation5], 0  ;;  %s216_s0 = inlined_call_operand.hbm [shape: f32[8,256], index: 0, kind: input, shape index: {}]   ;;  %s217_s1 = inlined_call_operand.hbm [shape: f32[8,256], index: 1, kind: input, shape index: {}]   ;;  %s218_s2 = inlined_call_operand.vmem [shape: f32[1,8,1], index: 2, kind: output, shape index: {0}]   ;;  %s219_s3 = inlined_call_operand.vmem [shape: f32[1,8,1], index: 3, kind: output, shape index: {1}]  }
   0x1   :  { %10 = vsyncpa [#allocation7], 0  ;;  %s157_s12 = smov [#allocation4]   ;;  %s158_s14 = smov [#allocation6]  }
   0x2   :  { %s23_s13 = sshll.u32 %s157_s12, 4  ;;  %s39_s15 = sshll.u32 %s158_s14, 4  ;;  %s24_s13 = int_to_ptr.vmem [resolvable:$true] %s23_s13  ;;  %s40_s15 = int_to_ptr.vmem [resolvable:$true] %s39_s15 }
   0x3   :  { %s109_s18 = scalar_lea.hbm %s216_s0, 256 }
   0x4   :  { %p110_p0 = scmp.ne.s32.totalorder %s216_s0, %s109_s18  ;;  %p113_p1 = scmp.lt.u32.totalorder %s109_s18, %s216_s0 }
   0x6   :  { %p115_p2 = pnand %p113_p1, %p110_p0 }
   0x8   :  { %118 = shalt.err (!%p115_p2)
}
   0x9   :  { %s119_s23 = scalar_lea.vmem %s24_s13, 256  ;;  %p124_p4 = scmp.lt.s32.totalorder %s24_s13, %s24_s13 }
   0xa   :  { %p120_p3 = scmp.ne.s32.totalorder %s24_s13, %s119_s23  ;;  %p125_p5 = scmp.lt.s32.totalorder %s119_s23, %s119_s23 }
   0xc   :  { %p126_p6 = por %p125_p5, %p124_p4 }
   0xe   :  { %p127_p7 = pnand %p126_p6, %p120_p3 }
  0x10   :  { %130 = shalt.err (!%p127_p7)
}
  0x11   :  { %26 = dma.hbm_to_vmem [thread:$0]  %s216_s0, 256, %s24_s13, [#allocation5]  }
  0x12   :  { %s131_s28 = scalar_lea.hbm %s217_s1, 256 }
  0x13   :  { %p132_p8 = scmp.ne.s32.totalorder %s217_s1, %s131_s28  ;;  %p135_p9 = scmp.lt.u32.totalorder %s131_s28, %s217_s1 }
  0x15   :  { %p137_p10 = pnand %p135_p9, %p132_p8 }
  0x17   :  { %140 = shalt.err (!%p137_p10)
}
  0x18   :  { %s141_s6 = scalar_lea.vmem %s40_s15, 256  ;;  %p146_p12 = scmp.lt.s32.totalorder %s40_s15, %s40_s15 }
  0x19   :  { %p142_p11 = scmp.ne.s32.totalorder %s40_s15, %s141_s6  ;;  %p147_p13 = scmp.lt.s32.totalorder %s141_s6, %s141_s6 }
  0x1b   :  { %p148_p0 = por %p147_p13, %p146_p12 }
  0x1d   :  { %p149_p1 = pnand %p148_p0, %p142_p11 }
  0x1f   :  { %152 = shalt.err (!%p149_p1)
}
  0x20   :  { %42 = dma.hbm_to_vmem [thread:$0]  %s217_s1, 256, %s40_s15, [#allocation7]  }
  0x21   :  { %153 = dma.done.wait [#allocation5], 256  }
  0x22   :  { %154 = vsyncadd [#allocation5], 4294967040 }
  0x23   :  { %155 = dma.done.wait [#allocation7], 256  }
  0x24   :  { %156 = vsyncadd [#allocation7], 4294967040  ;;  %vm61_vm0 = vcmask 7168   ;;  %v159_v0 = vmov 0.0   ;;  %v64_v1 = vld [vmem:[#allocation4] sm:$0xff]  ;;  %v65_v2 = vld [vmem:[#allocation4 + $0x8] sm:$0xff] }
  0x25   :  { %62 = vst.msk [vmem:[#allocation2] sm:$0xff] %vm61_vm0, %v159_v0  ;;  %63 = vst.msk [vmem:[#allocation3] sm:$0xff] %vm61_vm0, %v159_v0  ;;  %v66_v3 = vld [vmem:[#allocation6] sm:$0xff]  ;;  %v67_v4 = vld [vmem:[#allocation6 + $0x8] sm:$0xff] }
  0x26   :  { %v69_v5 = vmul.f32 %v66_v3, %v64_v1  ;;  %v70_v6 = vmul.f32 %v67_v4, %v65_v2  ;;  %v78_v7 = vadd.f32 %v66_v3, %v64_v1  ;;  %v79_v8 = vadd.f32 %v67_v4, %v65_v2 }
  0x28   :  { %v71_v9 = vadd.f32 %v70_v6, %v69_v5  ;;  %v80_v10 = vadd.f32 %v79_v8, %v78_v7 }
  0x2a   :  { %72 = vadd.xlane.f32.xlu0 %v71_v9 }
  0x2c   :  { %v68_v11 = vld [vmem:[#allocation2] sm:$0xff]  ;;  %v77_v14 = vld [vmem:[#allocation3] sm:$0xff] }
  0x2e   :  { %81 = vadd.xlane.f32.xlu0 %v80_v10 }
  0xb7   :  { %v73_v12 = vpop.xlane.xlu0 %72 }
  0xb8   :  { %v74_v13 = vadd.f32 %v73_v12, %v68_v11 }
  0xba   :  { %76 = vst.msk [vmem:[#allocation2] sm:$0xff] %vm61_vm0, %v74_v13 }
  0xbb   :  { %v82_v15 = vpop.xlane.xlu0 %81 }
  0xbc   :  { %v83_v16 = vadd.f32 %v82_v15, %v77_v14 }
  0xbe   :  { %84 = vst.msk [vmem:[#allocation3] sm:$0xff] %vm61_vm0, %v83_v16 }
  0xc1   :  { %v88_v17 = vld [vmem:[#allocation2] sm:$0xff] }
  0xc2   :  { %89 = vst.msk [vmem:[%s218_s2] sm:$0xff] %vm61_vm0, %v88_v17 }
  0xc5   :  { %v90_v18 = vld [vmem:[#allocation3] sm:$0xff] }
  0xc6   :  { %91 = vst.msk [vmem:[%s219_s3] sm:$0xff] %vm61_vm0, %v90_v18 }
  0xc7   :  { %100 = vsyncpa [#allocation5], 1 }
  0xc8   :  { %101 = vsyncpa [#allocation7], 1 }

</bundles_post_ra>
